<compile_context>
chip_gen: v5e
topology: v5e:2x2
jax: 0.10.0
libtpu: 0.0.40
codegen_flags: <defaults>
</compile_context>

<pallas_src>
import jax
import jax.numpy as jnp
from jax import lax
from jax.experimental import pallas as pl
from jax.experimental.pallas import tpu as pltpu

# Contract the leading (batch) axis of both operands: (n, d) x (n, d) -> (d, d).
_DN_ROWS = (((0,), (0,)), ((), ()))


# ----------------------------------------------------------------------------
# Hardware queries (best-effort; wrong answers only cost a little performance)
# ----------------------------------------------------------------------------
def _round_up(x: int, m: int) -> int:
    return ((x + m - 1) // m) * m


def _phys_vmem_bytes() -> int:
    try:
        return int(pltpu.get_tpu_info().vmem_capacity_bytes)
    except Exception:
        return 64 * 1024 * 1024          # conservative: v7x per-TC VMEM


def _num_tensorcores() -> int:
    # v7x has 2 TensorCores per chip; v5e/v6e have 1.  A wrong answer only
    # degenerates the parallel grid axis into a short sequential loop.
    try:
        info = pltpu.get_tpu_info()
        for attr in ("num_cores", "cores_per_chip", "num_tensorcores",
                     "tensor_cores_per_chip"):
            v = getattr(info, attr, None)
            if v is not None:
                v = int(v)
                if 1 <= v <= 16:
                    return v
    except Exception:
        pass
    return 1


# ----------------------------------------------------------------------------
# Kernels
# ----------------------------------------------------------------------------
def _make_small_kernel(n: int, d: int, use_bf16_mxu: bool):
    """Single-invocation kernel: whole operands resident in VMEM, exact 2-pass."""
    inv_n = 1.0 / n
    inv_d = 1.0 / d
    inv_cov = 1.0 / (float(n - 1) ** 2 * float(d) * float(d))
    mxu_dtype = jnp.bfloat16 if use_bf16_mxu else jnp.float32

    def kernel(fs_ref, ft_ref, out_ref):
        xs = fs_ref[...].astype(jnp.float32)                  # (n, d)
        xt = ft_ref[...].astype(jnp.float32)

        mean_s = jnp.sum(xs, axis=0, keepdims=True) * inv_n   # (1, d)
        mean_t = jnp.sum(xt, axis=0, keepdims=True) * inv_n

        # Center in f32 on the VPU; feed the MXU in bf16 only if inputs were bf16.
        cent_s = (xs - mean_s).astype(mxu_dtype)
        cent_t = (xt - mean_t).astype(mxu_dtype)

        # Leading (batch) axis contracted directly on the MXU -- no transpose.
        g_s = lax.dot_general(cent_s, cent_s, _DN_ROWS,
                              preferred_element_type=jnp.float32)
        g_t = lax.dot_general(cent_t, cent_t, _DN_ROWS,
                              preferred_element_type=jnp.float32)

        gdiff = g_s - g_t                 # == (n - 1) * (cov_s - cov_t)
        dmean = mean_s - mean_t
        out_ref[0, 0] = (jnp.sum(dmean * dmean) * inv_d
                         + jnp.sum(gdiff * gdiff) * inv_cov)

    return kernel


def _make_tiled_kernel(n: int, tile_n: int, tiles_per_slice: int,
                       needs_mask: bool, use_mxu_sums: bool):
    """Batch-tiled kernel: pivot-shifted Gram diff + column sums accumulated
    directly into per-slice output blocks (no HBM padding; ragged rows masked)."""

    def kernel(pivot_ref, fs_ref, ft_ref, gram_ref, sum_s_ref, sum_t_ref):
        c = pl.program_id(0)          # slice (TensorCore share), "parallel"
        i = pl.program_id(1)          # batch tile within slice, "arbitrary"

        @pl.when(i == 0)
        def _init():
            gram_ref[...] = jnp.zeros_like(gram_ref)
            sum_s_ref[...] = jnp.zeros_like(sum_s_ref)
            sum_t_ref[...] = jnp.zeros_like(sum_t_ref)

        pivot = pivot_ref[...]                                 # (1, d)
        xs = fs_ref[...] - pivot                               # pivot shift
        xt = ft_ref[...] - pivot

        if needs_mask:
            # Rows at or beyond N (ragged last tile / overshoot tile) are
            # unspecified in VMEM -- zero them before they touch sums/Gram.
            rows_left = n - (c * tiles_per_slice + i) * tile_n
            row_ids = lax.broadcasted_iota(jnp.int32, (tile_n, 1), 0)
            keep = row_ids < rows_left
            zero = jnp.zeros((), xs.dtype)
            xs = jnp.where(keep, xs, zero)
            xt = jnp.where(keep, xt, zero)

        # Gram difference accumulated in f32 (single d x d accumulator block).
        g_s = lax.dot_general(xs, xs, _DN_ROWS, preferred_element_type=jnp.float32)
        g_t = lax.dot_general(xt, xt, _DN_ROWS, preferred_element_type=jnp.float32)
        gram_ref[...] += (g_s - g_t)[None]

        # Column sums of the shifted tiles.
        if use_mxu_sums:
            # bf16 inputs: ones-vector contraction on the MXU, f32 accumulate
            # (avoids materializing an f32 up-cast of the tile).
            ones = jnp.ones((tile_n, 1), dtype=xs.dtype)
            s_s = lax.dot_general(ones, xs, _DN_ROWS,
                                  preferred_element_type=jnp.float32)
            s_t = lax.dot_general(ones, xt, _DN_ROWS,
                                  preferred_element_type=jnp.float32)
        else:
            s_s = jnp.sum(xs, axis=0, keepdims=True)           # exact f32
            s_t = jnp.sum(xt, axis=0, keepdims=True)
        sum_s_ref[...] += s_s[None]
        sum_t_ref[...] += s_t[None]

    return kernel


# ----------------------------------------------------------------------------
# Tile sizing
# ----------------------------------------------------------------------------
def _sublane_multiple(itemsize: int) -> int:
    return 16 if itemsize == 2 else (32 if itemsize == 1 else 8)


def _pick_tile_n(n: int, d: int, itemsize: int, phys_vmem: int) -> int:
    sub = _sublane_multiple(itemsize)
    # Resident f32 accumulator blocks (Gram diff + two sums, ~2x for buffering)
    # plus the broadcast pivot row.
    acc_bytes = 2 * (d * d + 2 * d) * 4 + 2 * d * itemsize
    total_cap = int(phys_vmem * 0.75)
    input_budget = total_cap - acc_bytes - (6 << 20)
    input_budget = max(4 << 20, min(input_budget, 32 << 20))
    per_row = 4 * d * itemsize            # 2 inputs x 2 pipeline buffers
    t = input_budget // per_row
    t = max(sub, min(int(t), 4096))
    if t >= 256:
        t = (t // 256) * 256               # MXU-friendly contraction depth
    else:
        t = (t // sub) * sub
    t = min(t, _round_up(n, sub))          # never (much) bigger than the data
    return max(sub, t)


# ----------------------------------------------------------------------------
# Wrapper
# ----------------------------------------------------------------------------
def coral_loss(f_s: jax.Array, f_t: jax.Array, *, tile_n=None,
               num_slices=None, force_tiled: bool = False) -> jax.Array:
    """CorrelationAlignmentLoss.forward(f_s, f_t) -> scalar float32."""
    assert f_s.shape == f_t.shape and f_s.ndim == 2, (f_s.shape, f_t.shape)
    assert f_s.dtype == f_t.dtype, "f_s / f_t must share a dtype"
    n, d = f_s.shape
    assert n >= 2, "CORAL needs at least 2 samples (N - 1 denominator)."

    itemsize = jnp.dtype(f_s.dtype).itemsize
    use_bf16_mxu = (f_s.dtype == jnp.bfloat16)
    phys_vmem = _phys_vmem_bytes()

    # ---------------- small path: whole problem resident in VMEM -------------
    mxu_itemsize = 2 if use_bf16_mxu else 4
    small_bytes = (2 * n * d * (itemsize + 4 + mxu_itemsize)
                   + 2 * d * d * 4 + (2 << 20))
    small_cap = min(int(phys_vmem * 0.55), 72 << 20)
    if (not force_tiled) and small_bytes <= small_cap:
        vmem_limit = int(min(phys_vmem * 0.9,
                             max(32 << 20, small_bytes * 1.4 + (4 << 20))))
        out = pl.pallas_call(
            _make_small_kernel(n, d, use_bf16_mxu),
            out_shape=jax.ShapeDtypeStruct((1, 1), jnp.float32),
            in_specs=[
                pl.BlockSpec(memory_space=pltpu.MemorySpace.VMEM),
                pl.BlockSpec(memory_space=pltpu.MemorySpace.VMEM),
            ],
            out_specs=pl.BlockSpec(memory_space=pltpu.MemorySpace.SMEM),
            compiler_params=pltpu.CompilerParams(vmem_limit_bytes=vmem_limit),
        )(f_s, f_t)
        return out[0, 0]

    # ---------------- tiled path: cdiv batch grid, no padding copies ---------
    sub = _sublane_multiple(itemsize)
    if tile_n is None:
        tile_n = _pick_tile_n(n, d, itemsize, phys_vmem)
    tile_n = max(sub, (int(tile_n) // sub) * sub)

    n_tiles = -(-n // tile_n)
    if num_slices is None:
        num_slices = _num_tensorcores()
    num_slices = max(1, min(int(num_slices), n_tiles))
    tiles_per_slice = -(-n_tiles // num_slices)
    needs_mask = (n % tile_n != 0) or (num_slices * tiles_per_slice > n_tiles)
    last_tile = n_tiles - 1

    # Per-feature pivot (first source row): bounds one-pass cancellation;
    # covariance is shift-invariant and the pivot cancels in mean_s - mean_t.
    pivot = lax.slice(f_s, (0, 0), (1, d))

    def x_map(c, i):
        t = jnp.minimum(c * tiles_per_slice + i, last_tile)   # clamp overshoot
        return (t, 0)

    working = (4 * tile_n * d * itemsize          # 2 inputs x 2 pipeline buffers
               + 2 * (d * d + 2 * d) * 4          # resident f32 accumulator blocks
               + 4 * d * itemsize + (2 << 20))
    vmem_limit = int(min(phys_vmem * 0.9,
                         max(48 << 20, working * 1.4 + (8 << 20))))

    kernel = _make_tiled_kernel(n, tile_n, tiles_per_slice, needs_mask,
                                use_mxu_sums=use_bf16_mxu)

    gram_p, sum_s_p, sum_t_p = pl.pallas_call(
        kernel,
        out_shape=(
            jax.ShapeDtypeStruct((num_slices, d, d), jnp.float32),
            jax.ShapeDtypeStruct((num_slices, 1, d), jnp.float32),
            jax.ShapeDtypeStruct((num_slices, 1, d), jnp.float32),
        ),
        grid_spec=pltpu.PrefetchScalarGridSpec(
            num_scalar_prefetch=0,
            grid=(num_slices, tiles_per_slice),
            in_specs=[
                pl.BlockSpec((1, d), lambda c, i: (0, 0)),        # pivot
                pl.BlockSpec((tile_n, d), x_map),                 # f_s
                pl.BlockSpec((tile_n, d), x_map),                 # f_t
            ],
            out_specs=(
                pl.BlockSpec((1, d, d), lambda c, i: (c, 0, 0)),  # Gram diff
                pl.BlockSpec((1, 1, d), lambda c, i: (c, 0, 0)),  # sum_s
                pl.BlockSpec((1, 1, d), lambda c, i: (c, 0, 0)),  # sum_t
            ),
        ),
        compiler_params=pltpu.CompilerParams(
            dimension_semantics=("parallel", "arbitrary"),
            vmem_limit_bytes=vmem_limit,
        ),
    )(pivot, f_s, f_t)

    # Tiny O(d^2) combine + finalize in plain XLA (negligible vs. the N*d reads).
    gram = jnp.sum(gram_p, axis=0)                 # (d, d)  == (n-1)*(cov diff) + n*outer terms
    mu_s = jnp.sum(sum_s_p, axis=0) / n            # (1, d)  shifted means (mean - pivot)
    mu_t = jnp.sum(sum_t_p, axis=0) / n
    dmean = mu_s - mu_t                            # pivot cancels
    cdiff = gram - n * (mu_s.T @ mu_s - mu_t.T @ mu_t)   # == (n-1)*(cov_s - cov_t)
    inv_cov = 1.0 / (float(n - 1) ** 2 * float(d) * float(d))
    loss = jnp.mean(dmean * dmean) + jnp.sum(cdiff * cdiff) * inv_cov
    return loss.astype(jnp.float32)


# ----------------------------------------------------------------------------
# Pure-JAX reference (mirrors the PyTorch module exactly)
# ----------------------------------------------------------------------------
def _coral_ref(f_s, f_t):
    f_s = f_s.astype(jnp.float32)
    f_t = f_t.astype(jnp.float32)
    mean_s = jnp.mean(f_s, axis=0, keepdims=True)
    mean_t = jnp.mean(f_t, axis=0, keepdims=True)
    cent_s = f_s - mean_s
    cent_t = f_t - mean_t
    cov_s = cent_s.T @ cent_s / (f_s.shape[0] - 1)
    cov_t = cent_t.T @ cent_t / (f_t.shape[0] - 1)
    mean_diff = jnp.mean((mean_s - mean_t) ** 2)
    cov_diff = jnp.mean((cov_s - cov_t) ** 2)
    return mean_diff + cov_diff


if __name__ == "__main__":
    key = jax.random.PRNGKey(0)
    k1, k2, k3, k4 = jax.random.split(key, 4)

    # Tolerances: TPU may run f32 dots in bf16 MXU passes by default (both in
    # the XLA reference and in the kernel), so comparisons are loose-ish.
    RTOL, ATOL = 2e-2, 1e-4

    # Small path: canonical (N, d) usage of the module, everything in VMEM.
    N, D = 8, 32
    f_s = jax.random.normal(k1, (N, D), dtype=jnp.float32)
    f_t = jax.random.normal(k2, (N, D), dtype=jnp.float32) * 1.3 + 0.5
    loss = coral_loss(f_s, f_t)
    jax.block_until_ready(loss)
    ref = _coral_ref(f_s, f_t)
    assert jnp.allclose(loss, ref, rtol=RTOL, atol=ATOL), (loss, ref)

    # Tiled path, forced: ragged last tile (90 % 32 != 0), non-128 feature dim,
    # two grid slices (exercises the parallel axis, row masking, and a fully
    # masked overshoot tile whose block index is clamped in the index_map).
    N2, D2 = 90, 40
    g_s = jax.random.normal(k3, (N2, D2), dtype=jnp.float32) * 0.7 + 0.2
    g_t = jax.random.normal(k4, (N2, D2), dtype=jnp.float32) * 1.1 - 0.3
    loss2 = coral_loss(g_s, g_t, tile_n=32, num_slices=2, force_tiled=True)
    jax.block_until_ready(loss2)
    ref2 = _coral_ref(g_s, g_t)
    assert jnp.allclose(loss2, ref2, rtol=RTOL, atol=ATOL), (loss2, ref2)

    print("KERNEL_OK")
</pallas_src>

<mosaic_0001>
module attributes {stable_mosaic.version = 11 : i64} {
  func.func @kernel(%arg0: memref<8x32xf32, #tpu.memory_space<vmem>>, %arg1: memref<8x32xf32, #tpu.memory_space<vmem>>, %arg2: memref<1x1xf32, #tpu.memory_space<smem>>) attributes {dimension_semantics = [], scalar_prefetch = 0 : i64, scratch_operands = 0 : i64, tpu.core_type = #tpu.core_type<tc>} {
    %c0 = arith.constant 0 : index
    %c0_0 = arith.constant 0 : index
    %0 = vector.load %arg0[%c0, %c0_0] : memref<8x32xf32, #tpu.memory_space<vmem>>, vector<8x32xf32>
    %c0_1 = arith.constant 0 : index
    %c0_2 = arith.constant 0 : index
    %1 = vector.load %arg1[%c0_1, %c0_2] : memref<8x32xf32, #tpu.memory_space<vmem>>, vector<8x32xf32>
    %cst = arith.constant dense<0.000000e+00> : vector<32xf32>
    %2 = vector.multi_reduction <add>, %0, %cst [0] : vector<8x32xf32> to vector<32xf32>
    %3 = vector.shape_cast %2 : vector<32xf32> to vector<1x32xf32>
    %cst_3 = arith.constant 1.250000e-01 : f32
    %4 = vector.broadcast %cst_3 : f32 to vector<1x32xf32>
    %5 = arith.mulf %3, %4 : vector<1x32xf32>
    %cst_4 = arith.constant dense<0.000000e+00> : vector<32xf32>
    %6 = vector.multi_reduction <add>, %1, %cst_4 [0] : vector<8x32xf32> to vector<32xf32>
    %7 = vector.shape_cast %6 : vector<32xf32> to vector<1x32xf32>
    %cst_5 = arith.constant 1.250000e-01 : f32
    %8 = vector.broadcast %cst_5 : f32 to vector<1x32xf32>
    %9 = arith.mulf %7, %8 : vector<1x32xf32>
    %10 = vector.broadcast %5 : vector<1x32xf32> to vector<8x32xf32>
    %11 = arith.subf %0, %10 : vector<8x32xf32>
    %12 = vector.broadcast %9 : vector<1x32xf32> to vector<8x32xf32>
    %13 = arith.subf %1, %12 : vector<8x32xf32>
    %cst_6 = arith.constant dense<0.000000e+00> : vector<32x32xf32>
    %14 = tpu.matmul %11, %11, %cst_6 {dimension_numbers = #tpu.dot_dimension_numbers<[0], [0], [1], [1], [0, 1, 1, 1], [], []>} : vector<8x32xf32>, vector<8x32xf32>, vector<32x32xf32> -> vector<32x32xf32>
    %cst_7 = arith.constant dense<0.000000e+00> : vector<32x32xf32>
    %15 = tpu.matmul %13, %13, %cst_7 {dimension_numbers = #tpu.dot_dimension_numbers<[0], [0], [1], [1], [0, 1, 1, 1], [], []>} : vector<8x32xf32>, vector<8x32xf32>, vector<32x32xf32> -> vector<32x32xf32>
    %16 = arith.subf %14, %15 : vector<32x32xf32>
    %17 = arith.subf %5, %9 : vector<1x32xf32>
    %18 = arith.mulf %17, %17 : vector<1x32xf32>
    %19 = vector.shape_cast %18 : vector<1x32xf32> to vector<1x1x32xf32>
    %cst_8 = arith.constant dense<0.000000e+00> : vector<1xf32>
    %20 = vector.multi_reduction <add>, %19, %cst_8 [1, 2] : vector<1x1x32xf32> to vector<1xf32>
    %21 = vector.shape_cast %20 : vector<1xf32> to vector<1x1x1xf32>
    %22 = vector.extract %21[0, 0, 0] : f32 from vector<1x1x1xf32>
    %cst_9 = arith.constant 3.125000e-02 : f32
    %23 = arith.mulf %22, %cst_9 : f32
    %24 = arith.mulf %16, %16 : vector<32x32xf32>
    %25 = vector.shape_cast %24 : vector<32x32xf32> to vector<1x32x32xf32>
    %cst_10 = arith.constant dense<0.000000e+00> : vector<1xf32>
    %26 = vector.multi_reduction <add>, %25, %cst_10 [1, 2] : vector<1x32x32xf32> to vector<1xf32>
    %27 = vector.shape_cast %26 : vector<1xf32> to vector<1x1x1xf32>
    %28 = vector.extract %27[0, 0, 0] : f32 from vector<1x1x1xf32>
    %cst_11 = arith.constant 1.99298465E-5 : f32
    %29 = arith.mulf %28, %cst_11 : f32
    %30 = arith.addf %23, %29 : f32
    %c0_12 = arith.constant 0 : index
    %c0_13 = arith.constant 0 : index
    %31 = memref.load %arg2[%c0_12, %c0_13] : memref<1x1xf32, #tpu.memory_space<smem>>
    memref.store %30, %arg2[%c0_12, %c0_13] : memref<1x1xf32, #tpu.memory_space<smem>>
    return
  }
}

</mosaic_0001>

<bundles_post_ra>
// kernel: tpu_custom_call.1
= control target key start
LH: loop header
LB: loop body
LE: loop exit
PB: predicated region body
PF: predicated region fallthrough
CT: control target
= control target key end

     0   :  { %7 = vsyncpa [#allocation3], 0  ;;  %s392_s0 = inlined_call_operand.hbm [shape: f32[8,32], index: 0, kind: input, shape index: {}]   ;;  %s393_s1 = inlined_call_operand.hbm [shape: f32[8,32], index: 1, kind: input, shape index: {}]   ;;  %s394_s2 = inlined_call_operand.hbm [shape: f32[1,1], index: 2, kind: output, shape index: {}]  }
   0x1   :  { %8 = vsyncpa [#allocation6], 0 }
   0x2   :  { %9 = vsyncpa [#allocation4], 0  ;;  %s15_s11 = sshll.u32 %s392_s0, 4  ;;  %s351_s12 = smov [#allocation2]   ;;  %s16_s11 = int_to_ptr.hbm [resolvable:$true] %s15_s11 }
   0x3   :  { %s17_s13 = sshll.u32 %s351_s12, 4  ;;  %s26_s16 = sshll.u32 %s393_s1, 4  ;;  %s18_s13 = int_to_ptr.vmem [resolvable:$true] %s17_s13  ;;  %s27_s16 = int_to_ptr.hbm [resolvable:$true] %s26_s16 }
   0x4   :  { %20 = dma.hbm_to_vmem [thread:$0]  %s16_s11, 128, %s18_s13, [#allocation3]  }
   0x5   :  { %s352_s17 = smov [#allocation5]  }
   0x6   :  { %s28_s18 = sshll.u32 %s352_s17, 4  ;;  %s29_s18 = int_to_ptr.vmem [resolvable:$true] %s28_s18 }
   0x7   :  { %31 = dma.hbm_to_vmem [thread:$0]  %s27_s16, 128, %s29_s18, [#allocation6]  }
   0x8   :  { %345 = dma.done.wait [#allocation3], 128  }
   0x9   :  { %346 = vsyncadd [#allocation3], 4294967168 }
   0xa   :  { %347 = dma.done.wait [#allocation6], 128  }
   0xb   :  { %348 = vsyncadd [#allocation6], 4294967168  ;;  %vm42_vm0 = vcmask 261120   ;;  %v40_v0 = vld [vmem:[#allocation2] sm:$0xff]  ;;  %v41_v1 = vld [vmem:[#allocation5] sm:$0xff]  ;;  %vm93_vm1 = vcmask 64512  }
   0xc   :  { %v43_v2 = vsel %vm42_vm0, %v40_v0, 0.0  ;;  %v51_v3 = vsel %vm42_vm0, %v41_v1, 0.0  ;;  %vm214_vm2 = vcmask 253952   ;;  %s255_s20 = sshll.u32 %s394_s2, 4  ;;  %s353_s25 = smov [#allocation7]   ;;  %s256_s20 = int_to_ptr.hbm [resolvable:$true] %s255_s20 }
   0xd   :  { %v44_v4 = vrot.slane %v43_v2, 4  ;;  %v52_v5 = vrot.slane %v51_v3, 4 }
   0xf   :  { %v45_v6 = vadd.f32 %v44_v4, %v43_v2  ;;  %v53_v7 = vadd.f32 %v52_v5, %v51_v3 }
  0x11   :  { %v46_v8 = vrot.slane %v45_v6, 2  ;;  %v54_v9 = vrot.slane %v53_v7, 2 }
  0x13   :  { %v47_v10 = vadd.f32 %v46_v8, %v45_v6  ;;  %v55_v11 = vadd.f32 %v54_v9, %v53_v7 }
  0x15   :  { %v48_v12 = vrot.slane %v47_v10, 1  ;;  %v56_v13 = vrot.slane %v55_v11, 1 }
  0x17   :  { %v49_v14 = vadd.f32 %v48_v12, %v47_v10  ;;  %v57_v15 = vadd.f32 %v56_v13, %v55_v11 }
  0x19   :  { %v50_v16 = vmul.f32 0.125, %v49_v14  ;;  %v58_v17 = vmul.f32 0.125, %v57_v15 }
  0x1b   :  { %v59_v18 = vsub.f32 %v40_v0, %v50_v16  ;;  %v60_v19 = vsub.f32 %v41_v1, %v58_v17  ;;  %v212_v28 = vsub.f32 %v50_v16, %v58_v17 }
  0x1d   :  { %61 = vxpose.xlu0.b32.start.end [1/1] (short) (narrow) %v59_v18, 32  ;;  %121 = vmatpush.msra.mxu0 %v59_v18  ;;  %v213_v29 = vmul.f32 %v212_v28, %v212_v28 }
  0x1e   :  { %275 = vmatpush.msra.mxu2 %v59_v18  ;;  %194 = vmatpush.msra.mxu1 %v60_v19 }
  0x1f   :  { %276 = vmatpush.msra.mxu3 %v60_v19  ;;  %v215_v30 = vsel %vm214_vm2, %v213_v29, 0.0 }
  0x20   :  { %216 = vadd.xlane.f32.xlu1 %v215_v30 }
  0x3d   :  { %135 = vxpose.xlu0.b32.start.end [1/1] (short) (narrow) %v60_v19, 32 }
  0x93   :  { %v217_v54 = vpop.xlane.xlu1 %216 }
  0x94   :  { %v218_v55 = vrot.slane %v217_v54, 4 }
  0x96   :  { %v219_v56 = vadd.f32 %v218_v55, %v217_v54 }
  0x98   :  { %v220_v57 = vrot.slane %v219_v56, 2 }
  0x9a   :  { %v221_v58 = vadd.f32 %v220_v57, %v219_v56 }
  0x9c   :  { %v222_v59 = vrot.slane %v221_v58, 1 }
  0x9e   :  { %v223_v60 = vadd.f32 %v222_v59, %v221_v58 }
  0xa0   :  { %277 = vpush %v223_v60 }
  0xc1   :  { %v77_v20 = vpop.trf.xlu0 }
  0xc2   :  { %267 = vmatmul.msk.f32.vlgmr.msra.gmra.mxu0 %vm93_vm1, %v77_v20 }
  0xc9   :  { %v78_v21 = vpop.trf.xlu0 }
  0xca   :  { %268 = vmatmul.msk.f32.gmra.mxu0 %vm93_vm1, %v78_v21 }
  0xd1   :  { %v79_v22 = vpop.trf.xlu0  ;;  %s278_s0 = spop %277 }
  0xd2   :  { %269 = vmatmul.msk.f32.vlgmr.msra.gmra.mxu2 %vm93_vm1, %v79_v22  ;;  %s225_s21 = smul.f32 0.03125, %s278_s0 }
  0xd9   :  { %v80_v23 = vpop.trf.xlu0 }
  0xda   :  { %270 = vmatmul.msk.f32.gmra.mxu2 %vm93_vm1, %v80_v23 }
  0xe1   :  { %v151_v24 = vpop.trf.xlu0 }
  0xe2   :  { %271 = vmatmul.msk.f32.vlgmr.msra.gmra.mxu1 %vm93_vm1, %v151_v24 }
  0xe9   :  { %v152_v25 = vpop.trf.xlu0 }
  0xea   :  { %272 = vmatmul.msk.f32.gmra.mxu1 %vm93_vm1, %v152_v25 }
  0xf1   :  { %v153_v26 = vpop.trf.xlu0 }
  0xf2   :  { %273 = vmatmul.msk.f32.vlgmr.msra.gmra.mxu3 %vm93_vm1, %v153_v26 }
  0xf9   :  { %v154_v27 = vpop.trf.xlu0 }
  0xfa   :  { %274 = vmatmul.msk.f32.gmra.mxu3 %vm93_vm1, %v154_v27 }
 0x13f   :  { %v123_v32 = vpop.f32.mrf.mxu0 }
 0x147   :  { %v126_v34 = vpop.f32.mrf.mxu0 }
 0x155   :  { %v129_v35 = vpop.f32.mrf.mxu2 }
 0x15d   :  { %v132_v44 = vpop.f32.mrf.mxu2 }
 0x15f   :  { %v196_v31 = vpop.f32.mrf.mxu1 }
 0x160   :  { %v208_v38 = vsub.f32 %v123_v32, %v196_v31 }
 0x162   :  { %v226_v41 = vmul.f32 %v208_v38, %v208_v38 }
 0x164   :  { %v230_v46 = vsel %vm42_vm0, %v226_v41, 0.0 }
 0x167   :  { %v199_v33 = vpop.f32.mrf.mxu1 }
 0x168   :  { %v209_v36 = vsub.f32 %v126_v34, %v199_v33 }
 0x16a   :  { %v227_v40 = vmul.f32 %v209_v36, %v209_v36 }
 0x16c   :  { %v231_v43 = vsel %vm42_vm0, %v227_v40, 0.0 }
 0x16d   :  { %v232_v49 = vadd.f32 %v231_v43, %v230_v46 }
 0x175   :  { %v202_v37 = vpop.f32.mrf.mxu3 }
 0x176   :  { %v210_v39 = vsub.f32 %v129_v35, %v202_v37 }
 0x178   :  { %v228_v42 = vmul.f32 %v210_v39, %v210_v39 }
 0x17a   :  { %v233_v47 = vsel %vm42_vm0, %v228_v42, 0.0 }
 0x17b   :  { %v234_v51 = vadd.f32 %v233_v47, %v232_v49 }
 0x17d   :  { %v205_v45 = vpop.f32.mrf.mxu3 }
 0x17e   :  { %v211_v48 = vsub.f32 %v132_v44, %v205_v45 }
 0x180   :  { %v229_v50 = vmul.f32 %v211_v48, %v211_v48 }
 0x182   :  { %v235_v52 = vsel %vm42_vm0, %v229_v50, 0.0 }
 0x183   :  { %v236_v53 = vadd.f32 %v235_v52, %v234_v51 }
 0x185   :  { %237 = vadd.xlane.f32.xlu1 %v236_v53 }
 0x1f8   :  { %v238_v61 = vpop.xlane.xlu1 %237 }
 0x1f9   :  { %v239_v62 = vrot.slane %v238_v61, 4 }
 0x1fb   :  { %v240_v63 = vadd.f32 %v239_v62, %v238_v61 }
 0x1fd   :  { %v241_v0 = vrot.slane %v240_v63, 2 }
 0x1ff   :  { %v242_v1 = vadd.f32 %v241_v0, %v240_v63 }
 0x201   :  { %v243_v2 = vrot.slane %v242_v1, 1 }
 0x203   :  { %v244_v3 = vadd.f32 %v243_v2, %v242_v1 }
 0x205   :  { %279 = vpush %v244_v3 }
 0x236   :  { %s280_s22 = spop %279 }
 0x237   :  { %s246_s23 = smul.f32 1.9929847e-05, %s280_s22 }
 0x239   :  { %s247_s24 = sadd.f32 %s246_s23, %s225_s21 }
 0x23b   :  { %249 = sst [smem:[#allocation7]] %s247_s24 }
 0x23c   :  { %258 = dma.smem_to_hbm %s353_s25, 16, %s256_s20, [#allocation4]  }
 0x23d   :  { %349 = dma.done.wait [#allocation4], 16  }
 0x23e   :  { %350 = vsyncadd [#allocation4], 4294967280 }
 0x23f   :  { %263 = sfence }
 0x240   :  { %264 = vsyncpa [#allocation3], 1 }
 0x241   :  { %265 = vsyncpa [#allocation6], 1 }
 0x242   :  { %266 = vsyncpa [#allocation4], 1 }

</bundles_post_ra>
